<compile_context>
chip_gen: v7x
topology: tpu7x:2x2x1
jax: 0.10.0
libtpu: 0.0.40
codegen_flags: <defaults>
</compile_context>

<pallas_src>
import functools

import jax
import jax.numpy as jnp
from jax.experimental import pallas as pl
from jax.experimental.pallas import tpu as pltpu


def _round_up(x, m):
    return (x + m - 1) // m * m


def _orthogonal(key, rows, cols, gain):
    """Deterministic orthogonal init (same semantics as torch.nn.init.orthogonal_)."""
    n, m = max(rows, cols), min(rows, cols)
    a = jax.random.normal(key, (n, m), dtype=jnp.float32)
    q, r = jnp.linalg.qr(a)
    q = q * jnp.sign(jnp.diagonal(r))[None, :]
    if rows < cols:
        q = q.T
    return gain * q[:rows, :cols]


def mlp_kernel(x_ref, w1_ref, b1_ref, w2_ref, b2_ref, o_ref, *, compute_dtype):
    # hidden = relu(x @ W1 + b1)   -- f32 accumulation on the MXU.
    # In-kernel cast of x (no-op for f32) rides a free VALU slot; avoids an
    # un-fused wrapper-side HBM cast pass.
    x = x_ref[...].astype(compute_dtype)
    h = jnp.dot(x, w1_ref[...], preferred_element_type=jnp.float32)
    h = jnp.maximum(h + b1_ref[...], 0.0)
    # out = hidden @ W2 + b2
    y = jnp.dot(h.astype(w2_ref.dtype), w2_ref[...],
                preferred_element_type=jnp.float32)
    o_ref[...] = (y + b2_ref[...]).astype(o_ref.dtype)


def _pick_tb(batch, in_dim, hid_p, out_dim, budget_bytes=12 * 1024 * 1024):
    """Largest batch tile (multiple of 8, <=4096) that fits a conservative
    VMEM activation budget (safe on v5e's 16 MiB scoped default and v7x's
    smaller physical VMEM), while keeping >= 2 grid steps so v7x's second
    TensorCore gets work."""
    # f32 bytes per batch row: double-buffered x + out blocks, plus the
    # in-kernel hidden activation (single buffer).
    per_row = 4 * (2 * in_dim + 2 * out_dim + hid_p)
    cap_vmem = max(8, (budget_bytes // per_row) // 8 * 8)
    # >= 2 grid steps whenever batch > 8 (megacore sharding on v7x).
    cap_cores = max(8, _round_up(pl.cdiv(batch, 2), 8))
    want = min(4096, _round_up(batch, 8))
    return int(min(want, cap_vmem, cap_cores))


@functools.partial(jax.jit, static_argnames=("tb", "use_bf16"))
def model_policy_forward(x, w1, b1, w2, b2, tb=None, use_bf16=False):
    """x: [B, inputs]; w1: [inputs, hidden]; w2: [hidden, outputs];
    biases: [hidden] and [outputs]."""
    b, inputs = x.shape
    hidden = w1.shape[1]
    outputs = w2.shape[1]
    out_dtype = x.dtype

    # --- pad only the hidden dim to 128 lanes (zero-padded, VMEM-internal) ---
    hid_p = _round_up(hidden, 128)
    w1p = jnp.pad(w1, ((0, 0), (0, hid_p - hidden)))
    b1p = jnp.pad(b1.reshape(1, -1), ((0, 0), (0, hid_p - hidden)))
    w2p = jnp.pad(w2, ((0, hid_p - hidden), (0, 0)))
    b2p = b2.reshape(1, -1)

    compute_dtype = jnp.bfloat16 if use_bf16 else x.dtype
    if use_bf16:
        # Weights are tiny; casting them once in the wrapper is negligible.
        w1p = w1p.astype(jnp.bfloat16)
        w2p = w2p.astype(jnp.bfloat16)
    # x stays in its original dtype in HBM; any cast happens inside the kernel.

    if tb is None:
        tb = _pick_tb(b, inputs, hid_p, outputs)
    grid = (pl.cdiv(b, tb),)

    x_item = jnp.dtype(x.dtype).itemsize
    w_item = 2 if use_bf16 else 4
    o_item = jnp.dtype(out_dtype).itemsize
    cost = pl.CostEstimate(
        flops=2 * b * (inputs * hid_p + hid_p * outputs),
        transcendentals=0,
        bytes_accessed=int(b * inputs * x_item
                           + (inputs * hid_p + hid_p * outputs) * w_item
                           + (hid_p + outputs) * 4
                           + b * outputs * o_item),
    )

    kernel = functools.partial(mlp_kernel, compute_dtype=compute_dtype)

    return pl.pallas_call(
        kernel,
        out_shape=jax.ShapeDtypeStruct((b, outputs), out_dtype),
        grid_spec=pltpu.PrefetchScalarGridSpec(
            num_scalar_prefetch=0,
            grid=grid,
            in_specs=[
                pl.BlockSpec((tb, inputs), lambda i: (i, 0)),      # x tile
                pl.BlockSpec((inputs, hid_p), lambda i: (0, 0)),   # W1 (resident)
                pl.BlockSpec((1, hid_p), lambda i: (0, 0)),        # b1
                pl.BlockSpec((hid_p, outputs), lambda i: (0, 0)),  # W2 (resident)
                pl.BlockSpec((1, outputs), lambda i: (0, 0)),      # b2
            ],
            out_specs=pl.BlockSpec((tb, outputs), lambda i: (i, 0)),
        ),
        compiler_params=pltpu.CompilerParams(
            dimension_semantics=("parallel",),
            vmem_limit_bytes=32 * 1024 * 1024),
        cost_estimate=cost,
    )(x, w1p, b1p, w2p, b2p)


def make_params(inputs_count, hidden_count, outputs_count, seed=0):
    k1, k2 = jax.random.split(jax.random.PRNGKey(seed))
    # PyTorch Linear.weight is [out, in]; orthogonal_ applies there, so build
    # [out, in] orthogonal and transpose to our [in, out] layout.
    w1 = _orthogonal(k1, hidden_count, inputs_count, gain=0.01).T
    b1 = jnp.zeros((hidden_count,), dtype=jnp.float32)
    w2 = _orthogonal(k2, outputs_count, hidden_count, gain=0.01).T
    b2 = jnp.zeros((outputs_count,), dtype=jnp.float32)
    return w1, b1, w2, b2


def _reference(x, w1, b1, w2, b2):
    return jnp.maximum(x @ w1 + b1.reshape(1, -1), 0.0) @ w2 + b2.reshape(1, -1)


if __name__ == "__main__":
    INPUTS, HIDDEN, OUTPUTS = 16, 32, 8
    w1, b1, w2, b2 = make_params(INPUTS, HIDDEN, OUTPUTS, seed=0)

    # Small demo batch (single grid step).
    key = jax.random.PRNGKey(0)
    x_small = jax.random.normal(key, (8, INPUTS), dtype=jnp.float32)
    out_small = jax.block_until_ready(model_policy_forward(x_small, w1, b1, w2, b2))
    ref_small = _reference(x_small, w1, b1, w2, b2)
    assert out_small.shape == (8, OUTPUTS)
    assert jnp.allclose(out_small, ref_small, atol=1e-5, rtol=1e-5)

    # Larger batch exercising multiple grid steps + a partial final tile.
    x_big = jax.random.normal(jax.random.PRNGKey(1), (300, INPUTS), dtype=jnp.float32)
    out_big = jax.block_until_ready(
        model_policy_forward(x_big, w1, b1, w2, b2, tb=128))
    ref_big = _reference(x_big, w1, b1, w2, b2)
    assert out_big.shape == (300, OUTPUTS)
    assert jnp.allclose(out_big, ref_big, atol=1e-5, rtol=1e-5)

    # Auto-picked tile (>= 2 grid steps for v7x megacore) on the big batch.
    out_auto = jax.block_until_ready(model_policy_forward(x_big, w1, b1, w2, b2))
    assert jnp.allclose(out_auto, ref_big, atol=1e-5, rtol=1e-5)

    # bf16 compute path (f32 accumulation, in-kernel cast) -- loose tolerance.
    out_bf16 = jax.block_until_ready(
        model_policy_forward(x_big, w1, b1, w2, b2, use_bf16=True))
    assert jnp.allclose(out_bf16, ref_big, atol=1e-5, rtol=5e-2)

    print("KERNEL_OK")
</pallas_src>

<mosaic_0001>
module attributes {stable_mosaic.version = 11 : i64} {
  func.func @mlp_kernel(%arg0: i32, %arg1: memref<8x16xf32, #tpu.memory_space<vmem>>, %arg2: memref<16x128xf32, #tpu.memory_space<vmem>>, %arg3: memref<1x128xf32, #tpu.memory_space<vmem>>, %arg4: memref<128x8xf32, #tpu.memory_space<vmem>>, %arg5: memref<1x8xf32, #tpu.memory_space<vmem>>, %arg6: memref<8x8xf32, #tpu.memory_space<vmem>>) attributes {dimension_semantics = [#tpu.dimension_semantics<parallel>], iteration_bounds = array<i64: 1>, scalar_prefetch = 0 : i64, scratch_operands = 0 : i64, tpu.core_type = #tpu.core_type<tc>, window_params = [{transform_indices = @transform_0, window_bounds = array<i64: 8, 16>}, {pipeline_mode = #tpu.pipeline_mode<synchronous>, transform_indices = @transform_1, window_bounds = array<i64: 16, 128>}, {pipeline_mode = #tpu.pipeline_mode<synchronous>, transform_indices = @transform_2, window_bounds = array<i64: 1, 128>}, {pipeline_mode = #tpu.pipeline_mode<synchronous>, transform_indices = @transform_3, window_bounds = array<i64: 128, 8>}, {pipeline_mode = #tpu.pipeline_mode<synchronous>, transform_indices = @transform_4, window_bounds = array<i64: 1, 8>}, {transform_indices = @transform_5, window_bounds = array<i64: 8, 8>}]} {
    %c0 = arith.constant 0 : index
    %c0_0 = arith.constant 0 : index
    %0 = vector.load %arg1[%c0, %c0_0] : memref<8x16xf32, #tpu.memory_space<vmem>>, vector<8x16xf32>
    %c0_1 = arith.constant 0 : index
    %c0_2 = arith.constant 0 : index
    %1 = vector.load %arg2[%c0_1, %c0_2] : memref<16x128xf32, #tpu.memory_space<vmem>>, vector<16x128xf32>
    %cst = arith.constant dense<0.000000e+00> : vector<8x128xf32>
    %2 = tpu.matmul %0, %1, %cst {dimension_numbers = #tpu.dot_dimension_numbers<[1], [0], [0], [1], [0, 0, 1, 1], [], []>} : vector<8x16xf32>, vector<16x128xf32>, vector<8x128xf32> -> vector<8x128xf32>
    %c0_3 = arith.constant 0 : index
    %c0_4 = arith.constant 0 : index
    %3 = vector.load %arg3[%c0_3, %c0_4] : memref<1x128xf32, #tpu.memory_space<vmem>>, vector<1x128xf32>
    %4 = vector.broadcast %3 : vector<1x128xf32> to vector<8x128xf32>
    %5 = arith.addf %2, %4 : vector<8x128xf32>
    %cst_5 = arith.constant 0.000000e+00 : f32
    %6 = vector.broadcast %cst_5 : f32 to vector<8x128xf32>
    %7 = arith.maximumf %5, %6 : vector<8x128xf32>
    %c0_6 = arith.constant 0 : index
    %c0_7 = arith.constant 0 : index
    %8 = vector.load %arg4[%c0_6, %c0_7] : memref<128x8xf32, #tpu.memory_space<vmem>>, vector<128x8xf32>
    %cst_8 = arith.constant dense<0.000000e+00> : vector<8x8xf32>
    %9 = tpu.matmul %7, %8, %cst_8 {dimension_numbers = #tpu.dot_dimension_numbers<[1], [0], [0], [1], [0, 0, 1, 1], [], []>} : vector<8x128xf32>, vector<128x8xf32>, vector<8x8xf32> -> vector<8x8xf32>
    %c0_9 = arith.constant 0 : index
    %c0_10 = arith.constant 0 : index
    %10 = vector.load %arg5[%c0_9, %c0_10] : memref<1x8xf32, #tpu.memory_space<vmem>>, vector<1x8xf32>
    %11 = vector.broadcast %10 : vector<1x8xf32> to vector<8x8xf32>
    %12 = arith.addf %9, %11 : vector<8x8xf32>
    %c0_11 = arith.constant 0 : index
    %c0_12 = arith.constant 0 : index
    %13 = vector.load %arg6[%c0_11, %c0_12] : memref<8x8xf32, #tpu.memory_space<vmem>>, vector<8x8xf32>
    tpu.vector_store %arg6[%c0_11, %c0_12], %12 {strides = array<i32>} : memref<8x8xf32, #tpu.memory_space<vmem>>, vector<8x8xf32>,
    return
  }
  func.func @transform_0(%arg0: i32) -> (i32, i32) {
    %c0_i32 = arith.constant 0 : i32
    %c0_i32_0 = arith.constant 0 : i32
    return %arg0, %c0_i32 : i32, i32
  }
  func.func @transform_1(%arg0: i32) -> (i32, i32) {
    %c0_i32 = arith.constant 0 : i32
    %c0_i32_0 = arith.constant 0 : i32
    %c0_i32_1 = arith.constant 0 : i32
    return %c0_i32, %c0_i32_0 : i32, i32
  }
  func.func @transform_2(%arg0: i32) -> (i32, i32) {
    %c0_i32 = arith.constant 0 : i32
    %c0_i32_0 = arith.constant 0 : i32
    %c0_i32_1 = arith.constant 0 : i32
    return %c0_i32, %c0_i32_0 : i32, i32
  }
  func.func @transform_3(%arg0: i32) -> (i32, i32) {
    %c0_i32 = arith.constant 0 : i32
    %c0_i32_0 = arith.constant 0 : i32
    %c0_i32_1 = arith.constant 0 : i32
    return %c0_i32, %c0_i32_0 : i32, i32
  }
  func.func @transform_4(%arg0: i32) -> (i32, i32) {
    %c0_i32 = arith.constant 0 : i32
    %c0_i32_0 = arith.constant 0 : i32
    %c0_i32_1 = arith.constant 0 : i32
    return %c0_i32, %c0_i32_0 : i32, i32
  }
  func.func @transform_5(%arg0: i32) -> (i32, i32) {
    %c0_i32 = arith.constant 0 : i32
    %c0_i32_0 = arith.constant 0 : i32
    return %arg0, %c0_i32 : i32, i32
  }
}

</mosaic_0001>

<bundles_post_ra>
// kernel: model_policy_forward.1
= control target key start
LH: loop header
LB: loop body
LE: loop exit
PB: predicated region body
PF: predicated region fallthrough
CT: control target
= control target key end

     0   :  { %v335_v2 = vmov 0.0|0.0   ;;  %vm336_vm0 = vmmov 0   ;;  %v337_v4 = vmov 0.0   ;;  %vm31_vm1 = vcmask 130048   ;;  %s444_s0 = inlined_call_operand.vmem [shape: f32[8,16], index: 0, kind: input, shape index: {}]   ;;  %s445_s1 = inlined_call_operand.vmem [shape: f32[16,128], index: 1, kind: input, shape index: {}]   ;;  %s446_s2 = inlined_call_operand.vmem [shape: f32[1,128], index: 2, kind: input, shape index: {}]   ;;  %s447_s3 = inlined_call_operand.vmem [shape: f32[128,8], index: 3, kind: input, shape index: {}]   ;;  %s448_s4 = inlined_call_operand.vmem [shape: f32[1,8], index: 4, kind: input, shape index: {}]   ;;  %s449_s5 = inlined_call_operand.hbm [shape: f32[8,8], index: 5, kind: output, shape index: {}]  }
   0x1   :  { %v22_v0 = vld [vmem:[%s445_s1] sm:$0xff]  ;;  %v23_v1 = vld [vmem:[%s445_s1 + $0x8] sm:$0xff]  ;;  %280 = vmatprep.subr.bf16.mxu0 %v335_v2  ;;  %242 = vmatprep.mubr.msk.f32.mxu0 %vm336_vm0, %v337_v4  ;;  %v108_v7 = vld [vmem:[%s447_s3 + $0x10] sm:$0xff] }
   0x2   :  { %v281_v3 = vpack.c.bf16 %v23_v1, %v22_v0  ;;  %v106_v5 = vld [vmem:[%s447_s3] sm:$0xff]  ;;  %v107_v6 = vld [vmem:[%s447_s3 + $0x8] sm:$0xff]  ;;  %283 = vmatprep.subr.bf16.mxu1 %v335_v2  ;;  %v109_v9 = vld [vmem:[%s447_s3 + $0x18] sm:$0xff]  ;;  %277 = vmatprep.mubr.msk.f32.mxu1 %vm336_vm0, %v337_v4 }
   0x3   :  { %v284_v8 = vpack.c.bf16 %v107_v6, %v106_v5  ;;  %v21_v10 = vld [vmem:[%s444_s0] sm:$0xff]  ;;  %v287_v11 = vpack.c.bf16 %v109_v9, %v108_v7  ;;  %v111_v13 = vld [vmem:[%s447_s3 + $0x28] sm:$0xff] }
   0x4   :  { %282 = vmatpush3.bf16.msra.mxu0 %v281_v3  ;;  %v110_v12 = vld [vmem:[%s447_s3 + $0x20] sm:$0xff] }
   0x5   :  { %285 = vmatpush3.bf16.msra.mxu1 %v284_v8 }
   0x6   :  { %286 = vmatprep.subr.bf16.mxu1 %v335_v2 }
   0x7   :  { %243 = vmatmul.mubr.msk.f32.vlgmr.msra.gmra.mrb[0].mxu0 %vm31_vm1, %v21_v10 }
   0x8   :  { %10 = vsyncpa [#allocation3], 0  ;;  %v290_v14 = vpack.c.bf16 %v111_v13, %v110_v12  ;;  %v112_v15 = vld [vmem:[%s447_s3 + $0x30] sm:$0xff]  ;;  %v113_v16 = vld [vmem:[%s447_s3 + $0x38] sm:$0xff]  ;;  %s338_s7 = smov [#allocation2]   ;;  %vm199_vm2 = vcmask 64512  }
   0x9   :  { %288 = vmatpush3.bf16.msra.mxu1 %v287_v11  ;;  %v293_v17 = vpack.c.bf16 %v113_v16, %v112_v15  ;;  %v114_v18 = vld [vmem:[%s447_s3 + $0x40] sm:$0xff]  ;;  %v115_v19 = vld [vmem:[%s447_s3 + $0x48] sm:$0xff]  ;;  %v116_v21 = vld [vmem:[%s447_s3 + $0x50] sm:$0xff]  ;;  %s207_s8 = sshll.u32 %s338_s7, 4  ;;  %s208_s8 = int_to_ptr.vmem [resolvable:$true] %s207_s8 }
   0xa   :  { %289 = vmatprep.subr.bf16.mxu1 %v335_v2  ;;  %v296_v20 = vpack.c.bf16 %v115_v19, %v114_v18  ;;  %v117_v22 = vld [vmem:[%s447_s3 + $0x58] sm:$0xff]  ;;  %v118_v24 = vld [vmem:[%s447_s3 + $0x60] sm:$0xff]  ;;  %v119_v25 = vld [vmem:[%s447_s3 + $0x68] sm:$0xff]  ;;  %p316_p1 = scmp.lt.s32.totalorder %s208_s8, %s208_s8 }
   0xb   :  { %v299_v23 = vpack.c.bf16 %v117_v22, %v116_v21  ;;  %v302_v26 = vpack.c.bf16 %v119_v25, %v118_v24  ;;  %v120_v27 = vld [vmem:[%s447_s3 + $0x70] sm:$0xff]  ;;  %v121_v28 = vld [vmem:[%s447_s3 + $0x78] sm:$0xff]  ;;  %v215_v30 = vld [vmem:[%s446_s2] ss:$0 sm:$0xff]  ;;  %s311_s3 = scalar_lea.vmem %s208_s8, 128 }
   0xc   :  { %v305_v29 = vpack.c.bf16 %v121_v28, %v120_v27  ;;  %v217_v35 = vld [vmem:[%s448_s4] ss:$0 sm:$0xff]  ;;  %p312_p0 = scmp.ne.s32.totalorder %s208_s8, %s311_s3  ;;  %p317_p2 = scmp.lt.s32.totalorder %s311_s3, %s311_s3 }
   0xd   :  { %291 = vmatpush3.bf16.msra.mxu1 %v290_v14 }
   0xe   :  { %292 = vmatprep.subr.bf16.mxu1 %v335_v2  ;;  %p318_p3 = por %p317_p2, %p316_p1 }
  0x10   :  { %p319_p4 = pnand %p318_p3, %p312_p0 }
  0x11   :  { %294 = vmatpush3.bf16.msra.mxu1 %v293_v17 }
  0x12   :  { %295 = vmatprep.subr.bf16.mxu1 %v335_v2 }
  0x15   :  { %297 = vmatpush3.bf16.msra.mxu1 %v296_v20 }
  0x16   :  { %298 = vmatprep.subr.bf16.mxu1 %v335_v2 }
  0x19   :  { %300 = vmatpush3.bf16.msra.mxu1 %v299_v23 }
  0x1a   :  { %301 = vmatprep.subr.bf16.mxu1 %v335_v2 }
  0x1d   :  { %303 = vmatpush3.bf16.msra.mxu1 %v302_v26 }
  0x1e   :  { %304 = vmatprep.subr.bf16.mxu1 %v335_v2 }
  0x21   :  { %306 = vmatpush3.bf16.msra.mxu1 %v305_v29 }
  0xda   :  { %v101_v31 = vpop.f32.mrb[0].mxu0 }
  0xdb   :  { %v102_v32 = vadd.f32 %v215_v30, %v101_v31  ;;  %v244_v33 = vpop.f32.mrb[1].mxu0 }
  0xdd   :  { %v105_v34 = vmax.f32 %v102_v32, 0.0 }
  0xdf   :  { %278 = vmatmul.mubr.f32.vlgmr.msra.gmra.mrb[0].mxu1 %v105_v34 }
 0x1b2   :  { %v195_v36 = vpop.f32.mrb[0].mxu1 }
 0x1b3   :  { %v196_v37 = vadd.f32 %v217_v35, %v195_v36  ;;  %v279_v38 = vpop.f32.mrb[1].mxu1 }
 0x1b5   :  { %200 = vst.msk [vmem:[#allocation2] sm:$0xff] %vm199_vm2, %v196_v37 }
 0x1b6   :  { %322 = shalt.err (!%p319_p4)
}
 0x1b7   :  { %s323_s10 = scalar_lea.hbm %s449_s5, 128 }
 0x1b8   :  { %p324_p5 = scmp.ne.s32.totalorder %s449_s5, %s323_s10  ;;  %p327_p6 = scmp.lt.u32.totalorder %s323_s10, %s449_s5 }
 0x1ba   :  { %p329_p7 = pnand %p327_p6, %p324_p5 }
 0x1bc   :  { %332 = shalt.err (!%p329_p7)
}
 0x1bd   :  { %210 = dma.vmem_to_hbm [thread:$0]  %s208_s8, 128, %s449_s5, [#allocation3]  }
 0x1be   :  { %333 = dma.done.wait [#allocation3], 128  }
 0x1bf   :  { %334 = vsyncadd [#allocation3], 4294967168 }
 0x1c0   :  { %214 = vsyncpa [#allocation3], 1 }

</bundles_post_ra>
